<compile_context>
chip_gen: v7x
topology: tpu7x:2x2x1
jax: 0.10.0
libtpu: 0.0.40
codegen_flags: <defaults>
</compile_context>

<pallas_src>
import jax
import jax.numpy as jnp
from jax import lax
from jax.experimental import pallas as pl
from jax.experimental.pallas import tpu as pltpu


# ------------------------- Pallas kernel (hot path) -------------------------
def _lowrank_kernel(x_ref, vt_ref, ue_ref, mask_ref, o_ref):
    # x_ref:    [TM, IN]   tile of flattened (B*S) input rows (pipelined)
    # vt_ref:   [R, IN]    V^T                (VMEM-resident across grid steps)
    # ue_ref:   [OUT, R]   U * diag(E)        (VMEM-resident across grid steps)
    # mask_ref: [1, R]     singular-value selection mask (gumbel-sigmoid)
    # o_ref:    [TM, OUT]
    x = x_ref[...]
    vt = vt_ref[...]
    ue = ue_ref[...]
    mask = mask_ref[...].astype(jnp.float32)                         # [1, R]

    # h[m, r] = sum_i x[m, i] * V_t[r, i]   == (V_t @ inputs) in the module
    h = lax.dot_general(x, vt, (((1,), (1,)), ((), ())),
                        preferred_element_type=jnp.float32)          # [TM, R]

    # Diagonal rank mask (equivalent to masking the columns of UE).
    h = (h * mask).astype(ue.dtype)                                  # [TM, R]

    # out[m, o] = sum_r h[m, r] * UE[o, r]
    out = lax.dot_general(h, ue, (((1,), (1,)), ((), ())),
                          preferred_element_type=jnp.float32)        # [TM, OUT]
    o_ref[...] = out.astype(o_ref.dtype)


def _round_up(n, m):
    return ((n + m - 1) // m) * m


def lowrank_linear_simple_forward(x, v_t, ue, mask, *, tm=None):
    """x: [B, S, IN], v_t: [R, IN], ue: [OUT, R], mask: [R] -> [B, S, OUT]."""
    B, S, IN = x.shape
    OUT, R = ue.shape
    M = B * S
    dbytes = jnp.dtype(x.dtype).itemsize

    x_flat = x.reshape(M, IN)
    mask2d = mask.reshape(1, R)

    # Resident weights in VMEM (single-buffered: constant index_map).
    resident_bytes = dbytes * (R * IN + OUT * R + R)

    # ---- pick a row-tile size TM (multiple of 8, bounded by a VMEM budget) ----
    if tm is None:
        # Keep resident weights + double-buffered (x tile + out tile) under
        # ~20 MiB so the default scoped-VMEM limit is safe on every generation.
        tile_budget = max(4 * 1024 * 1024, 20 * 1024 * 1024 - resident_bytes)
        per_row = 2 * (IN + OUT) * dbytes        # x tile + out tile, 2x buffered
        tm = max(8, min(1024, tile_budget // max(per_row, 1)))
        tm = (int(tm) // 8) * 8
    tm = min(tm, _round_up(M, 8))
    m_pad = _round_up(M, tm)
    if m_pad != M:
        x_flat = jnp.pad(x_flat, ((0, m_pad - M), (0, 0)))

    grid = (m_pad // tm,)

    flops = 2 * m_pad * R * (IN + OUT)
    bytes_accessed = dbytes * (m_pad * IN + R * IN + OUT * R + R + m_pad * OUT)

    out_flat = pl.pallas_call(
        _lowrank_kernel,
        out_shape=jax.ShapeDtypeStruct((m_pad, OUT), x.dtype),
        grid_spec=pltpu.PrefetchScalarGridSpec(
            num_scalar_prefetch=0,
            grid=grid,
            in_specs=[
                pl.BlockSpec((tm, IN), lambda i: (i, 0)),     # x tile (pipelined)
                pl.BlockSpec((R, IN), lambda i: (0, 0)),      # V_t   (resident)
                pl.BlockSpec((OUT, R), lambda i: (0, 0)),     # UE    (resident)
                pl.BlockSpec((1, R), lambda i: (0, 0)),       # mask  (resident)
            ],
            out_specs=pl.BlockSpec((tm, OUT), lambda i: (i, 0)),
        ),
        compiler_params=pltpu.CompilerParams(
            dimension_semantics=("parallel",),
            vmem_limit_bytes=48 * 1024 * 1024,
        ),
        cost_estimate=pl.CostEstimate(
            flops=flops, transcendentals=0, bytes_accessed=bytes_accessed),
    )(x_flat, v_t, ue, mask2d)

    if m_pad != M:
        out_flat = out_flat[:M]
    return out_flat.reshape(B, S, OUT)
    # TODO(synk): if OUT/IN grow so large that resident UE/V_t plus a row tile
    # no longer fit VMEM, add a second grid axis over OUT (and/or a K axis over
    # IN with an f32 accumulator scratch + pl.when init/finalize).


# ------------------------- parameter setup (glue) ---------------------------
def init_params(key, in_features, out_features, dtype=jnp.float32):
    """Deterministic stand-in for LowrankLinearSimple.__init__ (svd_vector=None)."""
    rank = min(in_features, out_features)
    (wkey,) = jax.random.split(key, 1)
    weight = jax.random.normal(wkey, (out_features, in_features), jnp.float32)

    # torch.svd_lowrank(weight, q=rank) with rank == min(dims) ~= full SVD.
    U, E, Vh = jnp.linalg.svd(weight, full_matrices=False)   # U:[out,r] E:[r] Vh:[r,in]
    UE = (U * E[None, :]).astype(dtype)                      # [out, rank]
    V_t = Vh.astype(dtype)                                   # [rank, in] == V.T
    E_train = jnp.linspace(6.0, 3.0, rank, dtype=dtype)      # logits for the mask
    return UE, V_t, E_train


def gumbel_sigmoid(key, logits, tau=0.4, eps=1e-20):
    """Training-mode mask: matches the PyTorch gumbel_sigmoid (given a seed)."""
    u = jax.random.uniform(key, logits.shape, logits.dtype)
    g = -jnp.log(-jnp.log(u + eps) + eps)
    return jax.nn.sigmoid((logits + g) / tau)


# ------------------------- reference (pure JAX) ------------------------------
def reference_forward(x, v_t, ue, mask):
    # inputs.transpose(1,2) -> [B, IN, S]; (UE*mask) @ (V_t @ x) ; transpose back
    xt = jnp.swapaxes(x, 1, 2)                               # [B, IN, S]
    h = jnp.einsum("ri,bis->brs", v_t, xt)                   # [B, R, S]
    o = jnp.einsum("or,brs->bos", ue * mask[None, :], h)     # [B, OUT, S]
    return jnp.swapaxes(o, 1, 2)                             # [B, S, OUT]


if __name__ == "__main__":
    B, S = 2, 8
    in_features, out_features = 32, 16
    tau = 0.4

    root = jax.random.PRNGKey(0)
    k_param, k_x, k_gumbel = jax.random.split(root, 3)

    UE, V_t, E_train = init_params(k_param, in_features, out_features)
    x = jax.random.normal(k_x, (B, S, in_features), jnp.float32)

    # training-mode mask (deterministic via seeded gumbel noise)
    mask = gumbel_sigmoid(k_gumbel, E_train, tau=tau)

    out = lowrank_linear_simple_forward(x, V_t, UE, mask)
    out = jax.block_until_ready(out)

    ref = reference_forward(x, V_t, UE, mask)
    assert out.shape == (B, S, out_features)
    assert jnp.allclose(out, ref, atol=1e-4, rtol=1e-4), "mismatch vs reference"

    print("KERNEL_OK")
</pallas_src>

<mosaic_0001>
module attributes {stable_mosaic.version = 11 : i64} {
  func.func @_lowrank_kernel(%arg0: i32, %arg1: memref<16x32xf32, #tpu.memory_space<vmem>>, %arg2: memref<16x32xf32, #tpu.memory_space<vmem>>, %arg3: memref<16x16xf32, #tpu.memory_space<vmem>>, %arg4: memref<1x16xf32, #tpu.memory_space<vmem>>, %arg5: memref<16x16xf32, #tpu.memory_space<vmem>>) attributes {dimension_semantics = [#tpu.dimension_semantics<parallel>], iteration_bounds = array<i64: 1>, scalar_prefetch = 0 : i64, scratch_operands = 0 : i64, tpu.core_type = #tpu.core_type<tc>, window_params = [{transform_indices = @transform_0, window_bounds = array<i64: 16, 32>}, {pipeline_mode = #tpu.pipeline_mode<synchronous>, transform_indices = @transform_1, window_bounds = array<i64: 16, 32>}, {pipeline_mode = #tpu.pipeline_mode<synchronous>, transform_indices = @transform_2, window_bounds = array<i64: 16, 16>}, {pipeline_mode = #tpu.pipeline_mode<synchronous>, transform_indices = @transform_3, window_bounds = array<i64: 1, 16>}, {transform_indices = @transform_4, window_bounds = array<i64: 16, 16>}]} {
    %c0 = arith.constant 0 : index
    %c0_0 = arith.constant 0 : index
    %0 = vector.load %arg1[%c0, %c0_0] : memref<16x32xf32, #tpu.memory_space<vmem>>, vector<16x32xf32>
    %c0_1 = arith.constant 0 : index
    %c0_2 = arith.constant 0 : index
    %1 = vector.load %arg2[%c0_1, %c0_2] : memref<16x32xf32, #tpu.memory_space<vmem>>, vector<16x32xf32>
    %c0_3 = arith.constant 0 : index
    %c0_4 = arith.constant 0 : index
    %2 = vector.load %arg3[%c0_3, %c0_4] : memref<16x16xf32, #tpu.memory_space<vmem>>, vector<16x16xf32>
    %c0_5 = arith.constant 0 : index
    %c0_6 = arith.constant 0 : index
    %3 = vector.load %arg4[%c0_5, %c0_6] : memref<1x16xf32, #tpu.memory_space<vmem>>, vector<1x16xf32>
    %cst = arith.constant dense<0.000000e+00> : vector<16x16xf32>
    %4 = tpu.matmul %0, %1, %cst {dimension_numbers = #tpu.dot_dimension_numbers<[1], [1], [0], [0], [0, 0, 1, 0], [], []>} : vector<16x32xf32>, vector<16x32xf32>, vector<16x16xf32> -> vector<16x16xf32>
    %5 = vector.broadcast %3 : vector<1x16xf32> to vector<16x16xf32>
    %6 = arith.mulf %4, %5 : vector<16x16xf32>
    %cst_7 = arith.constant dense<0.000000e+00> : vector<16x16xf32>
    %7 = tpu.matmul %6, %2, %cst_7 {dimension_numbers = #tpu.dot_dimension_numbers<[1], [1], [0], [0], [0, 0, 1, 0], [], []>} : vector<16x16xf32>, vector<16x16xf32>, vector<16x16xf32> -> vector<16x16xf32>
    %c0_8 = arith.constant 0 : index
    %c0_9 = arith.constant 0 : index
    %8 = vector.load %arg5[%c0_8, %c0_9] : memref<16x16xf32, #tpu.memory_space<vmem>>, vector<16x16xf32>
    tpu.vector_store %arg5[%c0_8, %c0_9], %7 {strides = array<i32>} : memref<16x16xf32, #tpu.memory_space<vmem>>, vector<16x16xf32>,
    return
  }
  func.func @transform_0(%arg0: i32) -> (i32, i32) {
    %c0_i32 = arith.constant 0 : i32
    %c0_i32_0 = arith.constant 0 : i32
    return %arg0, %c0_i32 : i32, i32
  }
  func.func @transform_1(%arg0: i32) -> (i32, i32) {
    %c0_i32 = arith.constant 0 : i32
    %c0_i32_0 = arith.constant 0 : i32
    %c0_i32_1 = arith.constant 0 : i32
    return %c0_i32, %c0_i32_0 : i32, i32
  }
  func.func @transform_2(%arg0: i32) -> (i32, i32) {
    %c0_i32 = arith.constant 0 : i32
    %c0_i32_0 = arith.constant 0 : i32
    %c0_i32_1 = arith.constant 0 : i32
    return %c0_i32, %c0_i32_0 : i32, i32
  }
  func.func @transform_3(%arg0: i32) -> (i32, i32) {
    %c0_i32 = arith.constant 0 : i32
    %c0_i32_0 = arith.constant 0 : i32
    %c0_i32_1 = arith.constant 0 : i32
    return %c0_i32, %c0_i32_0 : i32, i32
  }
  func.func @transform_4(%arg0: i32) -> (i32, i32) {
    %c0_i32 = arith.constant 0 : i32
    %c0_i32_0 = arith.constant 0 : i32
    return %arg0, %c0_i32 : i32, i32
  }
}

</mosaic_0001>

<bundles_post_ra>
// kernel: tpu_custom_call.1
= control target key start
LH: loop header
LB: loop body
LE: loop exit
PB: predicated region body
PF: predicated region fallthrough
CT: control target
= control target key end

     0   :  { %9 = vsyncpa [#allocation3], 0  ;;  %s524_s0 = inlined_call_operand.hbm [shape: f32[16,32], index: 0, kind: input, shape index: {}]   ;;  %s525_s1 = inlined_call_operand.hbm [shape: f32[16,32], index: 1, kind: input, shape index: {}]   ;;  %s526_s2 = inlined_call_operand.hbm [shape: f32[16,16], index: 2, kind: input, shape index: {}]   ;;  %s527_s3 = inlined_call_operand.vmem [shape: f32[1,16], index: 3, kind: input, shape index: {}]   ;;  %s528_s4 = inlined_call_operand.hbm [shape: f32[16,16], index: 4, kind: output, shape index: {}]  }
   0x1   :  { %10 = vsyncpa [#allocation6], 0 }
   0x2   :  { %11 = vsyncpa [#allocation4], 0  ;;  %s413_s15 = smov [#allocation5]   ;;  %s414_s17 = smov [#allocation2]  }
   0x3   :  { %s29_s16 = sshll.u32 %s413_s15, 4  ;;  %s17_s18 = sshll.u32 %s414_s17, 4  ;;  %s30_s16 = int_to_ptr.vmem [resolvable:$true] %s29_s16  ;;  %s444_s18 = int_to_ptr.vmem [resolvable:$true] %s17_s18 }
   0x4   :  { %s319_s21 = scalar_lea.hbm %s525_s1, 256 }
   0x5   :  { %p320_p0 = scmp.ne.s32.totalorder %s525_s1, %s319_s21  ;;  %p323_p1 = scmp.lt.u32.totalorder %s319_s21, %s525_s1 }
   0x7   :  { %p325_p2 = pnand %p323_p1, %p320_p0 }
   0x9   :  { %328 = shalt.err (!%p325_p2)
}
   0xa   :  { %s329_s26 = scalar_lea.vmem %s30_s16, 256  ;;  %p334_p4 = scmp.lt.s32.totalorder %s30_s16, %s30_s16 }
   0xb   :  { %p330_p3 = scmp.ne.s32.totalorder %s30_s16, %s329_s26  ;;  %p335_p5 = scmp.lt.s32.totalorder %s329_s26, %s329_s26 }
   0xd   :  { %p336_p6 = por %p335_p5, %p334_p4 }
   0xf   :  { %p337_p7 = pnand %p336_p6, %p330_p3 }
  0x11   :  { %340 = shalt.err (!%p337_p7)
}
  0x12   :  { %s415_s27 = smov 128   ;;  %s416_s28 = smov 8  }
  0x13   :  { %35 = dma.hbm_to_vmem [thread:$0]  %s525_s1, 256, %s30_s16, [#allocation6], %s415_s27, %s415_s27, %s416_s28  }
  0x14   :  { %s341_s7 = scalar_lea.hbm %s524_s0, 256 }
  0x15   :  { %p342_p8 = scmp.ne.s32.totalorder %s524_s0, %s341_s7  ;;  %p345_p9 = scmp.lt.u32.totalorder %s341_s7, %s524_s0 }
  0x17   :  { %p347_p10 = pnand %p345_p9, %p342_p8 }
  0x19   :  { %350 = shalt.err (!%p347_p10)
}
  0x1a   :  { %s351_s12 = scalar_lea.vmem %s444_s18, 256  ;;  %p356_p12 = scmp.lt.s32.totalorder %s444_s18, %s444_s18 }
  0x1b   :  { %p352_p11 = scmp.ne.s32.totalorder %s444_s18, %s351_s12  ;;  %p357_p13 = scmp.lt.s32.totalorder %s351_s12, %s351_s12 }
  0x1d   :  { %p358_p0 = por %p357_p13, %p356_p12 }
  0x1f   :  { %p359_p1 = pnand %p358_p0, %p352_p11 }
  0x21   :  { %362 = shalt.err (!%p359_p1)
}
  0x22   :  { %23 = dma.hbm_to_vmem [thread:$0]  %s524_s0, 256, %s444_s18, [#allocation3], %s415_s27, %s415_s27, %s416_s28  }
  0x23   :  { %s417_s14 = smov [#allocation7]   ;;  %s363_s19 = scalar_lea.hbm %s526_s2, 256 }
  0x24   :  { %s41_s15 = sshll.u32 %s417_s14, 4  ;;  %p364_p2 = scmp.ne.s32.totalorder %s526_s2, %s363_s19  ;;  %s42_s15 = int_to_ptr.vmem [resolvable:$true] %s41_s15 }
  0x25   :  { %p367_p3 = scmp.lt.u32.totalorder %s363_s19, %s526_s2 }
  0x27   :  { %p369_p4 = pnand %p367_p3, %p364_p2 }
  0x29   :  { %372 = shalt.err (!%p369_p4)
}
  0x2a   :  { %s373_s24 = scalar_lea.vmem %s42_s15, 256  ;;  %p378_p6 = scmp.lt.s32.totalorder %s42_s15, %s42_s15 }
  0x2b   :  { %p374_p5 = scmp.ne.s32.totalorder %s42_s15, %s373_s24  ;;  %p379_p7 = scmp.lt.s32.totalorder %s373_s24, %s373_s24 }
  0x2d   :  { %p380_p8 = por %p379_p7, %p378_p6 }
  0x2f   :  { %p381_p9 = pnand %p380_p8, %p374_p5 }
  0x31   :  { %384 = shalt.err (!%p381_p9)
}
  0x32   :  { %47 = dma.hbm_to_vmem [thread:$0]  %s526_s2, 256, %s42_s15, [#allocation6], %s415_s27, %s415_s27, %s416_s28  }
  0x33   :  { %407 = dma.done.wait [#allocation3], 256  }
  0x34   :  { %408 = vsyncadd [#allocation3], 4294967040 }
  0x35   :  { %409 = dma.done.wait [#allocation6], 512  }
  0x36   :  { %410 = vsyncadd [#allocation6], 4294966784  ;;  %vm66_vm0 = vcmask 261120   ;;  %vm162_vm1 = vcmask 130048   ;;  %v61_v0 = vld [vmem:[#allocation5] sm:$0xff]  ;;  %v62_v1 = vld [vmem:[#allocation5 + $0x8] sm:$0xff] }
  0x37   :  { %vm302_vm2 = vmpackc.low %vm66_vm0, %vm66_vm0  ;;  %v59_v2 = vld [vmem:[#allocation2] sm:$0xff]  ;;  %v301_v3 = vpack.c.bf16 %v62_v1, %v61_v0  ;;  %v64_v5 = vld [vmem:[#allocation7 + $0x8] sm:$0xff]  ;;  %s418_s26 = smov [#allocation8]  }
  0x38   :  { %291 = vmatprep.mubr.msk.f32.mxu0 %vm66_vm0, %v59_v2  ;;  %v63_v4 = vld [vmem:[#allocation7] sm:$0xff]  ;;  %vm308_vm3 = vmpackc.low %vm162_vm1, %vm162_vm1  ;;  %v60_v7 = vld [vmem:[#allocation2 + $0x8] sm:$0xff]  ;;  %s257_s29 = sshll.u32 %s418_s26, 4  ;;  %s258_s29 = int_to_ptr.vmem [resolvable:$true] %s257_s29 }
  0x39   :  { %v307_v6 = vpack.c.bf16 %v64_v5, %v63_v4  ;;  %303 = vmatprep.subr.msk.bf16.mxu0 %vm302_vm2, %v301_v3  ;;  %v274_v8 = vld [vmem:[%s527_s3] ss:$0 sm:$0xff]  ;;  %s385_s30 = scalar_lea.vmem %s258_s29, 256  ;;  %p390_p11 = scmp.lt.s32.totalorder %s258_s29, %s258_s29 }
  0x3a   :  { %306 = vmatpush3.bf16.xpose.msk.msra.mxu0 %vm302_vm2, %v301_v3  ;;  %p386_p10 = scmp.ne.s32.totalorder %s258_s29, %s385_s30  ;;  %p391_p12 = scmp.lt.s32.totalorder %s385_s30, %s385_s30 }
  0x3b   :  { %309 = vmatprep.subr.msk.bf16.mxu1 %vm308_vm3, %v307_v6 }
  0x3c   :  { %312 = vmatpush3.bf16.xpose.msk.msra.mxu1 %vm308_vm3, %v307_v6  ;;  %p392_p13 = por %p391_p12, %p390_p11 }
  0x3e   :  { %p393_p0 = pnand %p392_p13, %p386_p10 }
  0x41   :  { %292 = vmatmul.mubr.msk.f32.vlgmr.msra.gmra.mrb[0].mxu0 %vm66_vm0, %v60_v7 }
 0x114   :  { %v293_v9 = vpop.f32.mrb[0].mxu0 }
 0x115   :  { %v145_v10 = vpop.f32.mrb[1].mxu0  ;;  %v161_v12 = vmul.f32 %v293_v9, %v274_v8 }
 0x116   :  { %v160_v11 = vmul.f32 %v274_v8, %v145_v10 }
 0x118   :  { %298 = vmatprep.mubr.msk.f32.mxu1 %vm162_vm1, %v160_v11 }
 0x119   :  { %299 = vmatmul.mubr.msk.f32.vlgmr.msra.gmra.mrb[0].mxu1 %vm162_vm1, %v161_v12 }
 0x1ec   :  { %v300_v13 = vpop.f32.mrb[0].mxu1 }
 0x1ed   :  { %251 = vst.msk [vmem:[#allocation8 + $0x8] sm:$0xff] %vm162_vm1, %v300_v13  ;;  %v241_v14 = vpop.f32.mrb[1].mxu1 }
 0x1ee   :  { %250 = vst.msk [vmem:[#allocation8] sm:$0xff] %vm162_vm1, %v241_v14 }
 0x1ef   :  { %396 = shalt.err (!%p393_p0)
}
 0x1f0   :  { %s397_s6 = scalar_lea.hbm %s528_s4, 256 }
 0x1f1   :  { %p398_p1 = scmp.ne.s32.totalorder %s528_s4, %s397_s6  ;;  %p401_p2 = scmp.lt.u32.totalorder %s397_s6, %s528_s4 }
 0x1f3   :  { %p403_p3 = pnand %p401_p2, %p398_p1 }
 0x1f5   :  { %406 = shalt.err (!%p403_p3)
}
 0x1f6   :  { %263 = dma.vmem_to_hbm [thread:$0]  %s258_s29, 256, %s528_s4, [#allocation4], %s415_s27, %s415_s27, %s416_s28  }
 0x1f7   :  { %411 = dma.done.wait [#allocation4], 256  }
 0x1f8   :  { %412 = vsyncadd [#allocation4], 4294967040 }
 0x1f9   :  { %267 = vsyncpa [#allocation3], 1 }
 0x1fa   :  { %268 = vsyncpa [#allocation6], 1 }
 0x1fb   :  { %269 = vsyncpa [#allocation4], 1 }

</bundles_post_ra>
